<compile_context>
chip_gen: v7x
topology: tpu7x:2x2x1
jax: 0.10.0
libtpu: 0.0.40
codegen_flags: <defaults>
</compile_context>

<pallas_src>
import functools

import jax
import jax.numpy as jnp
from jax.experimental import pallas as pl
from jax.experimental.pallas import tpu as pltpu

LANE = 128


def _round_up(n, m):
    return ((n + m - 1) // m) * m


def _dqn_mlp_kernel(x_ref, w1_ref, b1_ref, w2_ref, b2_ref, w3_ref, b3_ref, out_ref):
    """Fused forward: 3 matmuls (bf16 operands, f32 accumulate) + 2 ReLUs (f32)."""
    cdt = w1_ref.dtype  # MXU operand dtype (bf16)

    x = x_ref[...].astype(cdt)

    # layer1 + ReLU (bias add / ReLU in f32 on the MXU accumulator)
    h = jnp.dot(x, w1_ref[...], preferred_element_type=jnp.float32)
    h = jnp.maximum(h + b1_ref[...], 0.0)

    # layer2 + ReLU
    h = jnp.dot(h.astype(cdt), w2_ref[...], preferred_element_type=jnp.float32)
    h = jnp.maximum(h + b2_ref[...], 0.0)

    # layer3 (no activation), lane-dense (padded) output store
    out = jnp.dot(h.astype(cdt), w3_ref[...], preferred_element_type=jnp.float32)
    out_ref[...] = (out + b3_ref[...]).astype(out_ref.dtype)


def prepare_params(params, *, compute_dtype=jnp.bfloat16):
    """ONE-TIME glue (do not call per forward).

    Takes PyTorch-convention params:
        w1: [hidden, state], b1: [hidden]
        w2: [hidden, hidden], b2: [hidden]
        w3: [action, hidden], b3: [action]
    Returns (prep, action_space) where prep holds pre-transposed [in, out] weights
    (cast to bf16 for the MXU), f32 [1, out] biases, and the action dim zero-padded
    to a multiple of 128 lanes.
    """
    action_space = params["w3"].shape[0]
    a_pad = _round_up(action_space, LANE)

    w3t = params["w3"].T                      # [hidden, action]
    b3 = params["b3"]
    pad = a_pad - action_space
    if pad:
        w3t = jnp.pad(w3t, ((0, 0), (0, pad)))
        b3 = jnp.pad(b3, ((0, pad),))

    prep = {
        "w1t": params["w1"].T.astype(compute_dtype),     # [state, hidden]
        "b1": params["b1"][None, :].astype(jnp.float32),  # [1, hidden]
        "w2t": params["w2"].T.astype(compute_dtype),     # [hidden, hidden]
        "b2": params["b2"][None, :].astype(jnp.float32),
        "w3t": w3t.astype(compute_dtype),                # [hidden, a_pad]
        "b3": b3[None, :].astype(jnp.float32),           # [1, a_pad]
    }
    return prep, action_space


@functools.partial(jax.jit, static_argnames=("action_space",))
def deep_q_forward(x, prep, action_space):
    """Pallas forward pass.

    x: [batch, state_space] float32
    prep: output of prepare_params()
    returns: [batch, action_space] float32
    """
    batch, state_space = x.shape
    hidden = prep["w1t"].shape[1]
    a_pad = prep["w3t"].shape[1]

    # Batch tile: multiple of 8, as large as is useful; weights stay resident.
    tb = 512 if batch >= 512 else _round_up(batch, 8)
    b_pad = _round_up(batch, tb)
    if b_pad != batch:
        x = jnp.pad(x, ((0, b_pad - batch), (0, 0)))  # padded rows -> extra rows dropped below

    grid = (b_pad // tb,)
    resident = lambda i: (0, 0)  # weights/biases: same block every grid step

    flops = 2 * b_pad * (state_space * hidden + hidden * hidden + hidden * a_pad)
    bytes_accessed = (
        x.size * x.dtype.itemsize
        + sum(int(v.size) * v.dtype.itemsize for v in prep.values())
        + b_pad * a_pad * 4
    )

    # NOTE: at hidden_dim=128 everything fits VMEM trivially on v5e/v6e/v7x.
    # TODO(synk): if hidden_dim is scaled >= ~2048, tile the layer-2 K axis with an
    # accumulator scratch and set vmem_limit_bytes (v7x has only 64 MiB VMEM).
    out = pl.pallas_call(
        _dqn_mlp_kernel,
        out_shape=jax.ShapeDtypeStruct((b_pad, a_pad), jnp.float32),
        grid_spec=pltpu.PrefetchScalarGridSpec(
            num_scalar_prefetch=0,
            grid=grid,
            in_specs=[
                pl.BlockSpec((tb, state_space), lambda i: (i, 0)),   # x tile
                pl.BlockSpec((state_space, hidden), resident),       # w1t
                pl.BlockSpec((1, hidden), resident),                 # b1
                pl.BlockSpec((hidden, hidden), resident),            # w2t
                pl.BlockSpec((1, hidden), resident),                 # b2
                pl.BlockSpec((hidden, a_pad), resident),             # w3t
                pl.BlockSpec((1, a_pad), resident),                  # b3
            ],
            out_specs=pl.BlockSpec((tb, a_pad), lambda i: (i, 0)),
        ),
        compiler_params=pltpu.CompilerParams(
            dimension_semantics=("parallel",),   # v7x: split batch tiles across 2 TCs
        ),
        cost_estimate=pl.CostEstimate(
            flops=flops, transcendentals=0, bytes_accessed=bytes_accessed),
    )(x, prep["w1t"], prep["b1"], prep["w2t"], prep["b2"], prep["w3t"], prep["b3"])

    return out[:batch, :action_space]


def init_params(key, state_space, action_space, hidden_dim):
    """Deterministic init mirroring nn.Linear's default U(-1/sqrt(in), 1/sqrt(in))."""
    def linear(k, out_f, in_f):
        kw, kb = jax.random.split(k)
        bound = 1.0 / jnp.sqrt(jnp.float32(in_f))
        w = jax.random.uniform(kw, (out_f, in_f), jnp.float32, -bound, bound)
        b = jax.random.uniform(kb, (out_f,), jnp.float32, -bound, bound)
        return w, b

    k1, k2, k3 = jax.random.split(key, 3)
    w1, b1 = linear(k1, hidden_dim, state_space)
    w2, b2 = linear(k2, hidden_dim, hidden_dim)
    w3, b3 = linear(k3, action_space, hidden_dim)
    return {"w1": w1, "b1": b1, "w2": w2, "b2": b2, "w3": w3, "b3": b3}


def _reference_forward_f32(x, p):
    """Pure f32 reference -- the exact PyTorch semantics."""
    h = jnp.maximum(x @ p["w1"].T + p["b1"], 0.0)
    h = jnp.maximum(h @ p["w2"].T + p["b2"], 0.0)
    return h @ p["w3"].T + p["b3"]


def _reference_forward_quantized(x, prep, action_space):
    """Reference that mirrors the kernel's bf16 operand quantization (f32 accumulate)."""
    f32 = jnp.float32
    q = lambda a: a.astype(jnp.bfloat16).astype(f32)
    h = jnp.maximum(q(x) @ prep["w1t"].astype(f32) + prep["b1"], 0.0)
    h = jnp.maximum(q(h) @ prep["w2t"].astype(f32) + prep["b2"], 0.0)
    out = q(h) @ prep["w3t"].astype(f32) + prep["b3"]
    return out[:, :action_space]


if __name__ == "__main__":
    # Small, CartPole-like shapes: batch=8, state_space=4, hidden=128, actions=2.
    batch, state_space, hidden_dim, action_space = 8, 4, 128, 2

    key = jax.random.PRNGKey(0)
    kx, kp = jax.random.split(key)
    x = jax.random.normal(kx, (batch, state_space), jnp.float32)
    params = init_params(kp, state_space, action_space, hidden_dim)

    # One-time parameter preparation (transpose / pad / cast) -- outside the hot path.
    prep, a_space = prepare_params(params)

    q = deep_q_forward(x, prep, a_space)
    q = jax.block_until_ready(q)
    assert q.shape == (batch, action_space)

    # Exact-math check vs a reference that matches the kernel's bf16 operand rounding.
    ref_q = _reference_forward_quantized(x, prep, action_space)
    assert jnp.allclose(q, ref_q, atol=1e-3, rtol=1e-3), "mismatch vs quantized reference"

    # Sanity check vs the pure-f32 PyTorch semantics (bf16 weights => small rounding).
    ref_f32 = _reference_forward_f32(x, params)
    assert jnp.allclose(q, ref_f32, atol=5e-2, rtol=5e-2), "mismatch vs f32 reference"

    print("KERNEL_OK")
</pallas_src>

<mosaic_0001>
module attributes {stable_mosaic.version = 11 : i64} {
  func.func @_dqn_mlp_kernel(%arg0: i32, %arg1: memref<8x4xf32, #tpu.memory_space<vmem>>, %arg2: memref<4x128xbf16, #tpu.memory_space<vmem>>, %arg3: memref<1x128xf32, #tpu.memory_space<vmem>>, %arg4: memref<128x128xbf16, #tpu.memory_space<vmem>>, %arg5: memref<1x128xf32, #tpu.memory_space<vmem>>, %arg6: memref<128x128xbf16, #tpu.memory_space<vmem>>, %arg7: memref<1x128xf32, #tpu.memory_space<vmem>>, %arg8: memref<8x128xf32, #tpu.memory_space<vmem>>) attributes {dimension_semantics = [#tpu.dimension_semantics<parallel>], iteration_bounds = array<i64: 1>, scalar_prefetch = 0 : i64, scratch_operands = 0 : i64, tpu.core_type = #tpu.core_type<tc>, window_params = [{transform_indices = @transform_0, window_bounds = array<i64: 8, 4>}, {pipeline_mode = #tpu.pipeline_mode<synchronous>, transform_indices = @transform_1, window_bounds = array<i64: 4, 128>}, {pipeline_mode = #tpu.pipeline_mode<synchronous>, transform_indices = @transform_2, window_bounds = array<i64: 1, 128>}, {pipeline_mode = #tpu.pipeline_mode<synchronous>, transform_indices = @transform_3, window_bounds = array<i64: 128, 128>}, {pipeline_mode = #tpu.pipeline_mode<synchronous>, transform_indices = @transform_4, window_bounds = array<i64: 1, 128>}, {pipeline_mode = #tpu.pipeline_mode<synchronous>, transform_indices = @transform_5, window_bounds = array<i64: 128, 128>}, {pipeline_mode = #tpu.pipeline_mode<synchronous>, transform_indices = @transform_6, window_bounds = array<i64: 1, 128>}, {transform_indices = @transform_7, window_bounds = array<i64: 8, 128>}]} {
    %c0 = arith.constant 0 : index
    %c0_0 = arith.constant 0 : index
    %0 = vector.load %arg1[%c0, %c0_0] : memref<8x4xf32, #tpu.memory_space<vmem>>, vector<8x4xf32>
    %1 = arith.truncf %0 : vector<8x4xf32> to vector<8x4xbf16>
    %c0_1 = arith.constant 0 : index
    %c0_2 = arith.constant 0 : index
    %2 = vector.load %arg2[%c0_1, %c0_2] : memref<4x128xbf16, #tpu.memory_space<vmem>>, vector<4x128xbf16>
    %cst = arith.constant dense<0.000000e+00> : vector<8x128xf32>
    %3 = tpu.matmul %1, %2, %cst {dimension_numbers = #tpu.dot_dimension_numbers<[1], [0], [0], [1], [0, 0, 1, 1], [], []>} : vector<8x4xbf16>, vector<4x128xbf16>, vector<8x128xf32> -> vector<8x128xf32>
    %c0_3 = arith.constant 0 : index
    %c0_4 = arith.constant 0 : index
    %4 = vector.load %arg3[%c0_3, %c0_4] : memref<1x128xf32, #tpu.memory_space<vmem>>, vector<1x128xf32>
    %5 = vector.broadcast %4 : vector<1x128xf32> to vector<8x128xf32>
    %6 = arith.addf %3, %5 : vector<8x128xf32>
    %cst_5 = arith.constant 0.000000e+00 : f32
    %7 = vector.broadcast %cst_5 : f32 to vector<8x128xf32>
    %8 = arith.maximumf %6, %7 : vector<8x128xf32>
    %9 = arith.truncf %8 : vector<8x128xf32> to vector<8x128xbf16>
    %c0_6 = arith.constant 0 : index
    %c0_7 = arith.constant 0 : index
    %10 = vector.load %arg4[%c0_6, %c0_7] : memref<128x128xbf16, #tpu.memory_space<vmem>>, vector<128x128xbf16>
    %cst_8 = arith.constant dense<0.000000e+00> : vector<8x128xf32>
    %11 = tpu.matmul %9, %10, %cst_8 {dimension_numbers = #tpu.dot_dimension_numbers<[1], [0], [0], [1], [0, 0, 1, 1], [], []>} : vector<8x128xbf16>, vector<128x128xbf16>, vector<8x128xf32> -> vector<8x128xf32>
    %c0_9 = arith.constant 0 : index
    %c0_10 = arith.constant 0 : index
    %12 = vector.load %arg5[%c0_9, %c0_10] : memref<1x128xf32, #tpu.memory_space<vmem>>, vector<1x128xf32>
    %13 = vector.broadcast %12 : vector<1x128xf32> to vector<8x128xf32>
    %14 = arith.addf %11, %13 : vector<8x128xf32>
    %cst_11 = arith.constant 0.000000e+00 : f32
    %15 = vector.broadcast %cst_11 : f32 to vector<8x128xf32>
    %16 = arith.maximumf %14, %15 : vector<8x128xf32>
    %17 = arith.truncf %16 : vector<8x128xf32> to vector<8x128xbf16>
    %c0_12 = arith.constant 0 : index
    %c0_13 = arith.constant 0 : index
    %18 = vector.load %arg6[%c0_12, %c0_13] : memref<128x128xbf16, #tpu.memory_space<vmem>>, vector<128x128xbf16>
    %cst_14 = arith.constant dense<0.000000e+00> : vector<8x128xf32>
    %19 = tpu.matmul %17, %18, %cst_14 {dimension_numbers = #tpu.dot_dimension_numbers<[1], [0], [0], [1], [0, 0, 1, 1], [], []>} : vector<8x128xbf16>, vector<128x128xbf16>, vector<8x128xf32> -> vector<8x128xf32>
    %c0_15 = arith.constant 0 : index
    %c0_16 = arith.constant 0 : index
    %20 = vector.load %arg7[%c0_15, %c0_16] : memref<1x128xf32, #tpu.memory_space<vmem>>, vector<1x128xf32>
    %21 = vector.broadcast %20 : vector<1x128xf32> to vector<8x128xf32>
    %22 = arith.addf %19, %21 : vector<8x128xf32>
    %c0_17 = arith.constant 0 : index
    %c0_18 = arith.constant 0 : index
    %23 = vector.load %arg8[%c0_17, %c0_18] : memref<8x128xf32, #tpu.memory_space<vmem>>, vector<8x128xf32>
    tpu.vector_store %arg8[%c0_17, %c0_18], %22 {strides = array<i32>} : memref<8x128xf32, #tpu.memory_space<vmem>>, vector<8x128xf32>,
    return
  }
  func.func @transform_0(%arg0: i32) -> (i32, i32) {
    %c0_i32 = arith.constant 0 : i32
    %c0_i32_0 = arith.constant 0 : i32
    return %arg0, %c0_i32 : i32, i32
  }
  func.func @transform_1(%arg0: i32) -> (i32, i32) {
    %c0_i32 = arith.constant 0 : i32
    %c0_i32_0 = arith.constant 0 : i32
    %c0_i32_1 = arith.constant 0 : i32
    return %c0_i32, %c0_i32_0 : i32, i32
  }
  func.func @transform_2(%arg0: i32) -> (i32, i32) {
    %c0_i32 = arith.constant 0 : i32
    %c0_i32_0 = arith.constant 0 : i32
    %c0_i32_1 = arith.constant 0 : i32
    return %c0_i32, %c0_i32_0 : i32, i32
  }
  func.func @transform_3(%arg0: i32) -> (i32, i32) {
    %c0_i32 = arith.constant 0 : i32
    %c0_i32_0 = arith.constant 0 : i32
    %c0_i32_1 = arith.constant 0 : i32
    return %c0_i32, %c0_i32_0 : i32, i32
  }
  func.func @transform_4(%arg0: i32) -> (i32, i32) {
    %c0_i32 = arith.constant 0 : i32
    %c0_i32_0 = arith.constant 0 : i32
    %c0_i32_1 = arith.constant 0 : i32
    return %c0_i32, %c0_i32_0 : i32, i32
  }
  func.func @transform_5(%arg0: i32) -> (i32, i32) {
    %c0_i32 = arith.constant 0 : i32
    %c0_i32_0 = arith.constant 0 : i32
    %c0_i32_1 = arith.constant 0 : i32
    return %c0_i32, %c0_i32_0 : i32, i32
  }
  func.func @transform_6(%arg0: i32) -> (i32, i32) {
    %c0_i32 = arith.constant 0 : i32
    %c0_i32_0 = arith.constant 0 : i32
    %c0_i32_1 = arith.constant 0 : i32
    return %c0_i32, %c0_i32_0 : i32, i32
  }
  func.func @transform_7(%arg0: i32) -> (i32, i32) {
    %c0_i32 = arith.constant 0 : i32
    %c0_i32_0 = arith.constant 0 : i32
    return %arg0, %c0_i32 : i32, i32
  }
}

</mosaic_0001>

<bundles_post_ra>
// kernel: deep_q_forward.1
= control target key start
LH: loop header
LB: loop body
LE: loop exit
PB: predicated region body
PF: predicated region fallthrough
CT: control target
= control target key end

     0   :  { %12 = vsyncpa [#allocation3], 0  ;;  %s613_s0 = inlined_call_operand.vmem [shape: f32[8,4], index: 0, kind: input, shape index: {}]   ;;  %s614_s1 = inlined_call_operand.vmem [shape: bf16[4,128], index: 1, kind: input, shape index: {}]   ;;  %s615_s2 = inlined_call_operand.vmem [shape: f32[1,128], index: 2, kind: input, shape index: {}]   ;;  %s616_s3 = inlined_call_operand.hbm [shape: bf16[128,128], index: 3, kind: input, shape index: {}]   ;;  %s617_s4 = inlined_call_operand.vmem [shape: f32[1,128], index: 4, kind: input, shape index: {}]   ;;  %s618_s5 = inlined_call_operand.hbm [shape: bf16[128,128], index: 5, kind: input, shape index: {}]   ;;  %s619_s6 = inlined_call_operand.vmem [shape: f32[1,128], index: 6, kind: input, shape index: {}]   ;;  %s620_s7 = inlined_call_operand.vmem [shape: f32[8,128], index: 7, kind: output, shape index: {}]  }
   0x1   :  { %13 = vsyncpa [#allocation5], 0  ;;  %s502_s24 = smov [#allocation2]   ;;  %s454_s28 = scalar_lea.hbm %s616_s3, 1024 }
   0x2   :  { %s25_s25 = sshll.u32 %s502_s24, 4  ;;  %p455_p0 = scmp.ne.s32.totalorder %s616_s3, %s454_s28  ;;  %s26_s25 = int_to_ptr.vmem [resolvable:$true] %s25_s25 }
   0x3   :  { %p458_p1 = scmp.lt.u32.totalorder %s454_s28, %s616_s3 }
   0x5   :  { %p460_p2 = pnand %p458_p1, %p455_p0 }
   0x7   :  { %463 = shalt.err (!%p460_p2)
}
   0x8   :  { %s464_s10 = scalar_lea.vmem %s26_s25, 1024  ;;  %p469_p4 = scmp.lt.s32.totalorder %s26_s25, %s26_s25 }
   0x9   :  { %p465_p3 = scmp.ne.s32.totalorder %s26_s25, %s464_s10  ;;  %p470_p5 = scmp.lt.s32.totalorder %s464_s10, %s464_s10 }
   0xb   :  { %p471_p6 = por %p470_p5, %p469_p4 }
   0xd   :  { %p472_p7 = pnand %p471_p6, %p465_p3 }
   0xf   :  { %475 = shalt.err (!%p472_p7)
}
  0x10   :  { %s503_s11 = smov 64   ;;  %s504_s12 = smov 4  }
  0x11   :  { %31 = dma.hbm_to_vmem [thread:$0]  %s616_s3, 1024, %s26_s25, [#allocation3], %s503_s11, %s503_s11, %s504_s12  }
  0x12   :  { %s505_s15 = smov [#allocation4]   ;;  %s476_s19 = scalar_lea.hbm %s618_s5, 1024 }
  0x13   :  { %s39_s16 = sshll.u32 %s505_s15, 4  ;;  %p477_p8 = scmp.ne.s32.totalorder %s618_s5, %s476_s19  ;;  %s40_s16 = int_to_ptr.vmem [resolvable:$true] %s39_s16 }
  0x14   :  { %p480_p9 = scmp.lt.u32.totalorder %s476_s19, %s618_s5 }
  0x16   :  { %p482_p10 = pnand %p480_p9, %p477_p8 }
  0x18   :  { %485 = shalt.err (!%p482_p10)
}
  0x19   :  { %s486_s24 = scalar_lea.vmem %s40_s16, 1024  ;;  %p491_p12 = scmp.lt.s32.totalorder %s40_s16, %s40_s16 }
  0x1a   :  { %p487_p11 = scmp.ne.s32.totalorder %s40_s16, %s486_s24  ;;  %p492_p13 = scmp.lt.s32.totalorder %s486_s24, %s486_s24 }
  0x1c   :  { %p493_p0 = por %p492_p13, %p491_p12 }
  0x1e   :  { %p494_p1 = pnand %p493_p0, %p487_p11 }
  0x20   :  { %497 = shalt.err (!%p494_p1)
}
  0x21   :  { %45 = dma.hbm_to_vmem [thread:$0]  %s618_s5, 1024, %s40_s16, [#allocation5], %s503_s11, %s503_s11, %s504_s12  }
  0x22   :  { %498 = dma.done.wait [#allocation3], 1024  }
  0x23   :  { %499 = vsyncadd [#allocation3], 4294966272 }
  0x24   :  { %500 = dma.done.wait [#allocation5], 1024  }
  0x25   :  { %501 = vsyncadd [#allocation5], 4294966272  ;;  %v506_v0 = vmov 0.0   ;;  %vm507_vm0 = vmmov 0   ;;  %vm69_vm1 = vcmask 1041408   ;;  %v55_v2 = vld [vmem:[%s613_s0] sm:$0xff] }
  0x26   :  { %386 = vmatprep.subr.bf16.mxu0 %v506_v0  ;;  %388 = vmatprep.mubr.msk.bf16.mxu0 %vm507_vm0, %v506_v0  ;;  %v57_v1 = vld [vmem:[%s614_s1] sm:$0x3]  ;;  %v56_v4 = vpack.c.bf16 %v55_v2, %v55_v2  ;;  %vm65_vm2 = vcmask 31744   ;;  %v439_v6 = vld [vmem:[#allocation2 + $0x8] sm:$0xff]   ;;  %v440_v7 = vld [vmem:[#allocation2 + $0x10] sm:$0xff]  }
  0x27   :  { %392 = vmatprep.subr.bf16.mxu1 %v506_v0  ;;  %408 = vmatprep.mubr.msk.bf16.mxu1 %vm507_vm0, %v506_v0  ;;  %v71_v3 = vsel %vm69_vm1, %v57_v1, 0  ;;  %v438_v5 = vld [vmem:[#allocation2] sm:$0xff]   ;;  %v441_v8 = vld [vmem:[#allocation2 + $0x18] sm:$0xff]   ;;  %v443_v10 = vld [vmem:[#allocation2 + $0x28] sm:$0xff]  }
  0x28   :  { %387 = vmatpush3.bf16.msra.mxu0 %v71_v3  ;;  %393 = vmatpush3.bf16.msra.mxu1 %v438_v5  ;;  %v442_v9 = vld [vmem:[#allocation2 + $0x20] sm:$0xff]   ;;  %v444_v11 = vld [vmem:[#allocation2 + $0x30] sm:$0xff]   ;;  %v445_v12 = vld [vmem:[#allocation2 + $0x38] sm:$0xff]  }
  0x29   :  { %412 = vmatprep.subr.bf16.mxu0 %v506_v0  ;;  %394 = vmatprep.subr.bf16.mxu1 %v506_v0  ;;  %v446_v13 = vld [vmem:[#allocation4] sm:$0xff]   ;;  %v447_v14 = vld [vmem:[#allocation4 + $0x8] sm:$0xff]   ;;  %v448_v15 = vld [vmem:[#allocation4 + $0x10] sm:$0xff]  }
  0x2a   :  { %v449_v16 = vld [vmem:[#allocation4 + $0x18] sm:$0xff]   ;;  %v450_v17 = vld [vmem:[#allocation4 + $0x20] sm:$0xff]   ;;  %v451_v18 = vld [vmem:[#allocation4 + $0x28] sm:$0xff]  }
  0x2b   :  { %389 = vmatmul.mubr.msk.bf16.vlgmr.msra.gmra.mrb[0].mxu0 %vm65_vm2, %v56_v4  ;;  %v346_v19 = vld [vmem:[%s615_s2] ss:$0 sm:$0xff]  ;;  %v452_v27 = vld [vmem:[#allocation4 + $0x30] sm:$0xff]   ;;  %v453_v28 = vld [vmem:[#allocation4 + $0x38] sm:$0xff]  }
  0x2c   :  { %428 = vmatprep.mubr.msk.bf16.mxu0 %vm507_vm0, %v506_v0  ;;  %395 = vmatpush3.bf16.msra.mxu1 %v439_v6  ;;  %v348_v29 = vld [vmem:[%s617_s4] ss:$0 sm:$0xff] }
  0x2d   :  { %396 = vmatprep.subr.bf16.mxu1 %v506_v0  ;;  %413 = vmatpush3.bf16.msra.mxu0 %v446_v13  ;;  %v357_v37 = vld [vmem:[%s619_s6] ss:$0 sm:$0xff] }
  0x2e   :  { %414 = vmatprep.subr.bf16.mxu0 %v506_v0 }
  0x30   :  { %397 = vmatpush3.bf16.msra.mxu1 %v440_v7 }
  0x31   :  { %398 = vmatprep.subr.bf16.mxu1 %v506_v0  ;;  %415 = vmatpush3.bf16.msra.mxu0 %v447_v14 }
  0x32   :  { %416 = vmatprep.subr.bf16.mxu0 %v506_v0 }
  0x34   :  { %399 = vmatpush3.bf16.msra.mxu1 %v441_v8 }
  0x35   :  { %400 = vmatprep.subr.bf16.mxu1 %v506_v0  ;;  %417 = vmatpush3.bf16.msra.mxu0 %v448_v15 }
  0x36   :  { %418 = vmatprep.subr.bf16.mxu0 %v506_v0 }
  0x38   :  { %401 = vmatpush3.bf16.msra.mxu1 %v442_v9 }
  0x39   :  { %402 = vmatprep.subr.bf16.mxu1 %v506_v0  ;;  %419 = vmatpush3.bf16.msra.mxu0 %v449_v16 }
  0x3a   :  { %420 = vmatprep.subr.bf16.mxu0 %v506_v0 }
  0x3c   :  { %403 = vmatpush3.bf16.msra.mxu1 %v443_v10 }
  0x3d   :  { %404 = vmatprep.subr.bf16.mxu1 %v506_v0  ;;  %421 = vmatpush3.bf16.msra.mxu0 %v450_v17 }
  0x3e   :  { %422 = vmatprep.subr.bf16.mxu0 %v506_v0 }
  0x40   :  { %405 = vmatpush3.bf16.msra.mxu1 %v444_v11 }
  0x41   :  { %406 = vmatprep.subr.bf16.mxu1 %v506_v0  ;;  %423 = vmatpush3.bf16.msra.mxu0 %v451_v18 }
  0x42   :  { %424 = vmatprep.subr.bf16.mxu0 %v506_v0 }
  0x44   :  { %407 = vmatpush3.bf16.msra.mxu1 %v445_v12 }
  0x45   :  { %425 = vmatpush3.bf16.msra.mxu0 %v452_v27 }
  0x46   :  { %426 = vmatprep.subr.bf16.mxu0 %v506_v0 }
  0x49   :  { %427 = vmatpush3.bf16.msra.mxu0 %v453_v28 }
  0xfe   :  { %v107_v20 = vpop.f32.mrb[0].mxu0 }
  0xff   :  { %v108_v21 = vadd.f32 %v346_v19, %v107_v20  ;;  %v390_v22 = vpop.f32.mrb[1].mxu0 }
 0x100   :  { %v110_v23 = vpop.f32.mrb[2].mxu0 }
 0x101   :  { %v113_v24 = vmax.f32 %v108_v21, 0.0  ;;  %v391_v25 = vpop.f32.mrb[3].mxu0 }
 0x103   :  { %v114_v26 = vpack.c.bf16 %v113_v24, %v113_v24 }
 0x105   :  { %409 = vmatmul.mubr.bf16.vlgmr.msra.gmra.mrb[0].mxu1 %v114_v26 }
 0x1d8   :  { %v220_v30 = vpop.f32.mrb[0].mxu1 }
 0x1d9   :  { %v221_v31 = vadd.f32 %v348_v29, %v220_v30  ;;  %v410_v32 = vpop.f32.mrb[1].mxu1 }
 0x1da   :  { %v223_v33 = vpop.f32.mrb[2].mxu1 }
 0x1db   :  { %v226_v34 = vmax.f32 %v221_v31, 0.0  ;;  %v411_v35 = vpop.f32.mrb[3].mxu1 }
 0x1dd   :  { %v227_v36 = vpack.c.bf16 %v226_v34, %v226_v34 }
 0x1df   :  { %429 = vmatmul.mubr.bf16.vlgmr.msra.gmra.mrb[4].mxu0 %v227_v36 }
 0x2b2   :  { %v333_v38 = vpop.f32.mrb[4].mxu0 }
 0x2b3   :  { %v334_v39 = vadd.f32 %v357_v37, %v333_v38  ;;  %v430_v40 = vpop.f32.mrb[5].mxu0 }
 0x2b4   :  { %v336_v41 = vpop.f32.mrb[6].mxu0 }
 0x2b5   :  { %339 = vst [vmem:[%s620_s7] sm:$0xff] %v334_v39  ;;  %v431_v42 = vpop.f32.mrb[7].mxu0 }
 0x2b6   :  { %344 = vsyncpa [#allocation3], 1 }
 0x2b7   :  { %345 = vsyncpa [#allocation5], 1 }

</bundles_post_ra>
